<compile_context>
chip_gen: v5e
topology: v5e:2x2
jax: 0.10.0
libtpu: 0.0.40
codegen_flags: <defaults>
</compile_context>

<pallas_src>
import functools
import math

import jax
import jax.numpy as jnp
from jax.experimental import pallas as pl
from jax.experimental.pallas import tpu as pltpu


# ----------------------------------------------------------------------------
# Buffer construction: sinusoidal positional-embedding table (matches torch).
# ----------------------------------------------------------------------------
def make_pos_embedding(num_hiddens: int, max_len: int = 120) -> jnp.ndarray:
    pos = jnp.arange(max_len, dtype=jnp.float32).reshape(-1, 1)            # (L, 1)
    div = jnp.power(
        10000.0,
        jnp.arange(0, num_hiddens, 2, dtype=jnp.float32) / num_hiddens,    # (H/2,)
    )
    X = pos / div                                                          # (L, H/2)
    pe = jnp.zeros((max_len, num_hiddens), dtype=jnp.float32)
    pe = pe.at[:, 0::2].set(jnp.sin(X))
    pe = pe.at[:, 1::2].set(jnp.cos(X))
    return pe[None, :, :]                                                  # (1, L, H)


# ----------------------------------------------------------------------------
# Kernels
# ----------------------------------------------------------------------------
def _pe_add_kernel(x_ref, pe_ref, o_ref):
    # eval-mode forward: X + PE  (dropout is identity)
    y = x_ref[...].astype(jnp.float32) + pe_ref[...].astype(jnp.float32)
    o_ref[...] = y.astype(o_ref.dtype)


def _hash_u32(idx, seed):
    # splitmix32-style finalizer: cheap, stateless, per-element hash.
    key = idx ^ (seed * jnp.uint32(0x9E3779B9))
    key = (key ^ (key >> 16)) * jnp.uint32(0x7FEB352D)
    key = (key ^ (key >> 15)) * jnp.uint32(0x846CA68B)
    return key ^ (key >> 16)


def _pe_add_dropout_kernel(seed_ref, x_ref, pe_ref, o_ref, *,
                           rate: float, tile_s: int, hidden: int,
                           n_seq_tiles: int):
    # train-mode forward: inverted dropout applied to (X + PE), f32 compute.
    y = x_ref[...].astype(jnp.float32) + pe_ref[...].astype(jnp.float32)   # (1,ts,H)

    si = pl.program_id(0).astype(jnp.uint32)          # seq-tile index (outer axis)
    b = pl.program_id(1).astype(jnp.uint32)           # batch index   (inner axis)
    tile_id = b * jnp.uint32(n_seq_tiles) + si        # unique per grid tile

    row = jax.lax.broadcasted_iota(jnp.uint32, y.shape, 1)
    col = jax.lax.broadcasted_iota(jnp.uint32, y.shape, 2)
    idx = (tile_id * jnp.uint32(tile_s) + row) * jnp.uint32(hidden) + col

    bits = _hash_u32(idx, seed_ref[0].astype(jnp.uint32))
    # integer-threshold compare: drop with probability `rate`
    threshold = jnp.uint32(min(int(rate * 4294967296.0), 4294967295))
    keep = bits >= threshold
    scale = jnp.float32(1.0 / (1.0 - rate))
    o_ref[...] = (y * jnp.where(keep, scale, jnp.float32(0.0))).astype(o_ref.dtype)


# ----------------------------------------------------------------------------
# Wrapper
# ----------------------------------------------------------------------------
def positional_encoding(x: jnp.ndarray,
                        pos_embedding: jnp.ndarray,
                        *,
                        dropout_rate: float = 0.1,
                        training: bool = False,
                        seed: int = 0,
                        seq_tile: int = 512) -> jnp.ndarray:
    """x: (B, S, H); pos_embedding: (1, max_len, H) f32.  Returns x.dtype."""
    B, S, H = x.shape
    _, max_len, Hp = pos_embedding.shape
    assert Hp == H, "hidden mismatch between x and pos_embedding"
    assert S <= max_len, "sequence longer than max_len"

    # Seq tile: full S for small shapes, <=512 rows otherwise so each VMEM
    # buffer is tile_s*H*4 bytes (e.g. 512x512 f32 = 1 MiB) -> fits every gen.
    tile_s = S if S <= seq_tile else seq_tile
    n_seq_tiles = int(pl.cdiv(S, tile_s))

    # seq tiles outer, batch inner: PE block index does not change along the
    # inner (batch) axis, so Pallas keeps the PE tile resident instead of
    # re-streaming it from HBM per batch element.
    grid = (n_seq_tiles, B)

    blk = (1, tile_s, H)
    x_spec = pl.BlockSpec(blk, lambda si, b, *_: (b, si, 0))
    pe_spec = pl.BlockSpec(blk, lambda si, b, *_: (0, si, 0))
    o_spec = pl.BlockSpec(blk, lambda si, b, *_: (b, si, 0))

    out_shape = jax.ShapeDtypeStruct((B, S, H), x.dtype)
    cparams = pltpu.CompilerParams(
        dimension_semantics=("parallel", "parallel"))

    if (not training) or dropout_rate == 0.0:
        grid_spec = pltpu.PrefetchScalarGridSpec(
            num_scalar_prefetch=0, grid=grid,
            in_specs=[x_spec, pe_spec], out_specs=o_spec)
        return pl.pallas_call(
            _pe_add_kernel, out_shape=out_shape, grid_spec=grid_spec,
            compiler_params=cparams,
        )(x, pos_embedding)

    if dropout_rate >= 1.0:
        # PyTorch Dropout(p=1) zeroes the output; avoid 1/(1-p) = inf.
        return jnp.zeros_like(x)

    seed_arr = jnp.asarray([seed], dtype=jnp.int32)
    kern = functools.partial(
        _pe_add_dropout_kernel, rate=float(dropout_rate),
        tile_s=tile_s, hidden=H, n_seq_tiles=n_seq_tiles)
    grid_spec = pltpu.PrefetchScalarGridSpec(
        num_scalar_prefetch=1, grid=grid,
        in_specs=[x_spec, pe_spec], out_specs=o_spec)
    return pl.pallas_call(
        kern, out_shape=out_shape, grid_spec=grid_spec,
        compiler_params=cparams,
    )(seed_arr, x, pos_embedding)


# ----------------------------------------------------------------------------
# Demo / self-check
# ----------------------------------------------------------------------------
if __name__ == "__main__":
    B, S, H = 2, 8, 32
    max_len = 120
    dropout = 0.1

    key = jax.random.PRNGKey(0)
    x = jax.random.normal(key, (B, S, H), dtype=jnp.float32)
    pos_embedding = make_pos_embedding(H, max_len)
    y_ref = x + pos_embedding[:, :S, :]

    # Eval-mode forward (dropout == identity): deterministic, checked vs ref.
    y = positional_encoding(x, pos_embedding,
                            dropout_rate=dropout, training=False)
    y = jax.block_until_ready(y)
    assert y.shape == (B, S, H)
    assert jnp.allclose(y, y_ref, atol=1e-6), "eval-mode mismatch vs reference"

    # Train-mode forward: kept elements must equal (X+PE)/(1-p), dropped are 0.
    y_train = positional_encoding(x, pos_embedding,
                                  dropout_rate=dropout, training=True, seed=42)
    y_train = jax.block_until_ready(y_train)
    assert y_train.shape == (B, S, H)
    scale = 1.0 / (1.0 - dropout)
    kept = y_train != 0
    assert jnp.allclose(jnp.where(kept, y_train, 0.0),
                        jnp.where(kept, y_ref * scale, 0.0),
                        atol=1e-5), "train-mode kept values mismatch"

    print("KERNEL_OK")
</pallas_src>

<mosaic_0001>
module attributes {stable_mosaic.version = 11 : i64} {
  func.func @_pe_add_kernel(%arg0: i32, %arg1: i32, %arg2: memref<1x8x32xf32, #tpu.memory_space<vmem>>, %arg3: memref<1x8x32xf32, #tpu.memory_space<vmem>>, %arg4: memref<1x8x32xf32, #tpu.memory_space<vmem>>) attributes {dimension_semantics = [#tpu.dimension_semantics<parallel>, #tpu.dimension_semantics<parallel>], iteration_bounds = array<i64: 1, 2>, scalar_prefetch = 0 : i64, scratch_operands = 0 : i64, tpu.core_type = #tpu.core_type<tc>, window_params = [{transform_indices = @transform_0, window_bounds = array<i64: 1, 8, 32>}, {transform_indices = @transform_1, window_bounds = array<i64: 1, 8, 32>}, {transform_indices = @transform_2, window_bounds = array<i64: 1, 8, 32>}]} {
    %c0 = arith.constant 0 : index
    %c0_0 = arith.constant 0 : index
    %c0_1 = arith.constant 0 : index
    %0 = vector.load %arg2[%c0, %c0_0, %c0_1] : memref<1x8x32xf32, #tpu.memory_space<vmem>>, vector<1x8x32xf32>
    %c0_2 = arith.constant 0 : index
    %c0_3 = arith.constant 0 : index
    %c0_4 = arith.constant 0 : index
    %1 = vector.load %arg3[%c0_2, %c0_3, %c0_4] : memref<1x8x32xf32, #tpu.memory_space<vmem>>, vector<1x8x32xf32>
    %2 = arith.addf %0, %1 : vector<1x8x32xf32>
    %c0_5 = arith.constant 0 : index
    %c0_6 = arith.constant 0 : index
    %c0_7 = arith.constant 0 : index
    %3 = vector.load %arg4[%c0_5, %c0_6, %c0_7] : memref<1x8x32xf32, #tpu.memory_space<vmem>>, vector<1x8x32xf32>
    tpu.vector_store %arg4[%c0_5, %c0_6, %c0_7], %2 {strides = array<i32>} : memref<1x8x32xf32, #tpu.memory_space<vmem>>, vector<1x8x32xf32>,
    return
  }
  func.func @transform_0(%arg0: i32, %arg1: i32) -> (i32, i32, i32) {
    %c0_i32 = arith.constant 0 : i32
    %c0_i32_0 = arith.constant 0 : i32
    return %arg1, %arg0, %c0_i32 : i32, i32, i32
  }
  func.func @transform_1(%arg0: i32, %arg1: i32) -> (i32, i32, i32) {
    %c0_i32 = arith.constant 0 : i32
    %c0_i32_0 = arith.constant 0 : i32
    %c0_i32_1 = arith.constant 0 : i32
    return %c0_i32, %arg0, %c0_i32_0 : i32, i32, i32
  }
  func.func @transform_2(%arg0: i32, %arg1: i32) -> (i32, i32, i32) {
    %c0_i32 = arith.constant 0 : i32
    %c0_i32_0 = arith.constant 0 : i32
    return %arg1, %arg0, %c0_i32 : i32, i32, i32
  }
}

</mosaic_0001>

<bundles_post_ra>
// kernel: tpu_custom_call.1
= control target key start
LH: loop header
LB: loop body
LE: loop exit
PB: predicated region body
PF: predicated region fallthrough
CT: control target
= control target key end

     0   :  { %7 = vsyncpa [#allocation3], 0  ;;  %s546_s0 = inlined_call_operand.vmem [shape: f32[2,8,32], index: 0, kind: input, shape index: {}]   ;;  %s547_s1 = inlined_call_operand.vmem [shape: f32[1,120,32], index: 1, kind: input, shape index: {}]   ;;  %s548_s2 = inlined_call_operand.hbm [shape: f32[2,8,32], index: 2, kind: output, shape index: {}]  }
   0x1   :  { %9 = vsyncpa [#allocation3 + $0x1], 0  ;;  %s451_s9 = smov 0   ;;  %s453_s10 = smov 0  }
   0x2   :  { %s455_s11 = smov 0   ;;  %s457_s12 = smov 0  }
   0x3   :  { %s459_s13 = smov 0   ;;  %s461_s14 = smov 0  }
   0x4 LB: > { %s289_s15 = sadd.s32 4294967295, %s434_s14   ;;  %s290_s16 = sadd.s32 4294967294, %s434_s14   ;;  %s434_s14 = sphi %s461_s14, %s15_s14   ;;  %s430_s13 = sphi %s459_s13, %s555_s13   ;;  %s426_s12 = sphi %s457_s12, %s554_s12   ;;  %s422_s11 = sphi %s455_s11, %s553_s11   ;;  %s418_s10 = sphi %s453_s10, %s552_s10   ;;  %s414_s9 = sphi %s451_s9, %s551_s9  }
   0x5   : > { %s24_s17 = sadd.s32 1, %s430_s13  ;;  %s90_s18 = sadd.s32 1, %s422_s11 }
   0x6   : > { %p25_p0 = scmp.ge.s32.totalorder %s24_s17, 2  ;;  %p100_p1 = scmp.ne.s32.totalorder %s422_s11, %s418_s10 }
   0x7   : > { %p101_p2 = scmp.eq.s32.totalorder %s289_s15, 1  ;;  %p106_p3 = scmp.ne.s32.totalorder %s418_s10, %s414_s9 }
   0x8   : > { %s557_s17 = smov (%p25_p0, %s24_s17), 0  ;;  %p107_p5 = scmp.eq.s32.totalorder %s290_s16, 1 }
   0x9   : > { %p489_p4 = por %p101_p2, %p100_p1  ;;  %s85_s20 = ssub.s32 %s430_s13, %s557_s17 }
   0xa   : > { %p294_p6 = scmp.ge.s32.totalorder %s434_s14, 1  ;;  %p88_p7 = scmp.eq.s32.totalorder %s85_s20, 0 }
   0xb   : > { %p496_p8 = por %p107_p5, %p106_p3  ;;  %p142_p9 = scmp.lt.s32.totalorder %s434_s14, 3 }
   0xc   : > { %s502_s22 = scalar_select %p88_p7, %s422_s11, %s90_s18  }
   0xd   : > { %p143_p10 = pnand %p294_p6, %p142_p9 }
   0xe   : > { %s167_s23 = sand.u32 (!%p143_p10), 1, %s418_s10   ;;  %p170_p11 = scmp.lt.s32.totalorder (!%p143_p10), %s426_s12, 1 }
   0xf   : > { %146 = sbr.rel (%p143_p10) target bundleno = 33 (0x21), region = 28  ;;  %s295_s24 = sshll.u32 (!%p143_p10), %s167_s23, 3 }
  0x10   : > { %s298_s25 = sshll.u32 (!%p143_p10), %s426_s12, 3  ;;  %s169_s4 = scalar_lea.vmem (!%p143_p10), [#allocation2], %s295_s24 }
  0x11   : > { %s198_s28 = scalar_lea.hbm (!%p143_p10), %s548_s2, %s298_s25  ;;  %s200_s5 = sshll.u32 (!%p143_p10), %s169_s4, 4  ;;  %s201_s5 = int_to_ptr.vmem [resolvable:$true] %s200_s5 }
  0x12   : > { %s202_s15 = sshll.u32 (!%p143_p10), %s198_s28, 4  ;;  %s187_s16 = scalar_lea.sflag (!%p143_p10), [#allocation3], %s167_s23  ;;  %s203_s15 = int_to_ptr.hbm [resolvable:$true] %s202_s15 }
  0x13   : > { %s376_s25 = scalar_lea.hbm (!%p143_p10), %s548_s2, 16 }
  0x14   : > { %s559_s12 = smov (!%p170_p11, %s426_s12), 1  ;;  %v182_v0 = vld [vmem:[%s547_s1] sm:$0xff]  ;;  %vm184_vm0 = vcmask 261120  }
  0x15   : > { %s296_s29 = sshll.u32 %s559_s12, 3  ;;  %s370_s12 = sshra.s32 %s203_s15, 4  ;;  %s371_s12 = int_to_ptr.hbm [resolvable:$true] %s370_s12 }
  0x16   : > { %s176_s8 = scalar_lea.vmem %s546_s0, %s296_s29  ;;  %s372_s18 = scalar_lea.hbm %s371_s12, 8 }
  0x17   : > { %v181_v1 = vld [vmem:[%s176_s8] sm:$0xff]  ;;  %p373_p12 = scmp.ne.s32.totalorder %s371_s12, %s372_s18  ;;  %p377_p1 = scmp.lt.s32.totalorder %s371_s12, %s548_s2 }
  0x18   : > { %v183_v2 = vadd.f32 %v182_v0, %v181_v1  ;;  %p378_p2 = scmp.lt.s32.totalorder %s376_s25, %s372_s18 }
  0x19   : > { %p374_p13 = pnand %p373_p12, %p489_p4 }
  0x1a   : > { %185 = vst.msk [vmem:[%s169_s4] sm:$0xff] %vm184_vm0, %v183_v2  ;;  %p379_p3 = por %p378_p2, %p377_p1 }
  0x1b   : > { %p375_p0 = pneg %p374_p13 }
  0x1d   : > { %p380_p5 = pnand %p379_p3, %p375_p0 }
  0x1f   : > { %383 = shalt.err (!%p380_p5)
}
  0x20   : > { %301 = dma.vmem_to_hbm [thread:$0]  (%p489_p4), %s201_s5, 128, %s203_s15, %s187_s16  }
  0x21 PF: > { %p307_p6 = scmp.ge.s32.totalorder %s434_s14, 2  ;;  %s214_s23 = sand.u32 1, %s414_s9  }
  0x22   : > { %s215_s28 = scalar_lea.sflag [#allocation3], %s214_s23 }
  0x23   : > { %p304_p7 = pnand %p307_p6, %p496_p8 }
  0x25   : > { %p305_p9 = pneg %p304_p7 }
  0x27   : > { %409 = dma.done.wait (%p305_p9), %s215_s28, 128  }
  0x28   : > { %411 = vsyncadd (%p305_p9), %s215_s28, 4294967168  ;;  %s15_s14 = sadd.s32 1, %s434_s14   ;;  %s551_s9 = smov %s418_s10 }
  0x29   : > { %p12_p10 = scmp.ge.s32.totalorder %s15_s14, 4   ;;  %s552_s10 = smov %s422_s11 }
  0x2a   : > { %s553_s11 = smov %s502_s22  ;;  %s554_s12 = smov %s430_s13 }
  0x2b   : > { %s555_s13 = smov %s557_s17  ;;  %14 = sbr.rel (!%p12_p10) target bundleno = 4 (0x4), region = 66 }
  0x30   :  { %221 = vsyncpa [#allocation3], 1 }
  0x31   :  { %223 = vsyncpa [#allocation3 + $0x1], 1 }

</bundles_post_ra>
